<compile_context>
chip_gen: v7x
topology: tpu7x:2x2x1
jax: 0.10.0
libtpu: 0.0.40
codegen_flags: <defaults>
</compile_context>

<pallas_src>
import functools

import jax
import jax.numpy as jnp
from jax.experimental import pallas as pl
from jax.experimental.pallas import tpu as pltpu


VMEM_SPEC = pl.BlockSpec(memory_space=pltpu.MemorySpace.VMEM)


# ---------------- fused kernel ----------------

def _feature_extractor(pool, h, wg_ref, bg_ref, wl_ref):
    # XtoGlobal (mean pool + Linear) followed by g + lin(relu(g)).
    g = jnp.dot(pool, h, preferred_element_type=jnp.float32)
    g = jnp.dot(g, wg_ref[...], preferred_element_type=jnp.float32) + bg_ref[...]
    return g + jnp.dot(jnp.maximum(g, 0.0), wl_ref[...],
                       preferred_element_type=jnp.float32)


def _gin_fused_kernel(*refs, num_layers, apply_bn):
    (x_ref, a_ref, p_ref,
     np_wg, np_bg, np_wl,
     init_w, init_b) = refs[:8]
    layer_refs = refs[8:8 + 9 * num_layers]
    aft_w, aft_b, fin_w, fin_b = refs[8 + 9 * num_layers: 12 + 9 * num_layers]
    o_ref = refs[-1]

    f32 = jnp.float32
    x = x_ref[...]
    a_hat = a_ref[...]       # A + I (self-term pre-folded)
    pool = p_ref[...]        # (num_graphs, num_nodes) mean-pool matrix

    # no_prop feature extractor
    out = _feature_extractor(pool, x, np_wg, np_bg, np_wl)

    # initial_lin_x
    h = jnp.dot(x, init_w[...], preferred_element_type=f32) + init_b[...]

    # statically unrolled layer loop
    for i in range(num_layers):
        (w1, b1, w2, b2, bn_s, bn_t,
         fe_wg, fe_bg, fe_wl) = layer_refs[9 * i: 9 * i + 9]

        # eval-mode BatchNorm1d on the conv input (only for i>0, static skip);
        # feature extractor below still sees the raw conv output (matches torch).
        h_in = h * bn_s[...] + bn_t[...] if apply_bn[i] else h

        # GINConv (eps=0, sum agg): h_agg = (A + I) @ h_in
        h_agg = jnp.dot(a_hat, h_in, preferred_element_type=f32)
        # GINNetwork: lin_2(h_agg + relu(lin_1(h_agg)))
        z = jnp.dot(h_agg, w1[...], preferred_element_type=f32) + b1[...]
        h = jnp.dot(h_agg + jnp.maximum(z, 0.0), w2[...],
                    preferred_element_type=f32) + b2[...]
        out = out + _feature_extractor(pool, h, fe_wg, fe_bg, fe_wl)

    # head: relu / L ; relu(after_conv) + skip ; dropout(eval)=id ; final ; log_softmax
    out = jnp.maximum(out, 0.0) * (1.0 / num_layers)
    out = jnp.maximum(jnp.dot(out, aft_w[...], preferred_element_type=f32)
                      + aft_b[...], 0.0) + out
    # TODO(synk): dropout is identity (eval mode); training-mode RNG dropout not ported.
    logits = jnp.dot(out, fin_w[...], preferred_element_type=f32) + fin_b[...]
    m = jnp.max(logits, axis=-1, keepdims=True)
    zc = logits - m
    o_ref[...] = zc - jnp.log(jnp.sum(jnp.exp(zc), axis=-1, keepdims=True))


# ---------------- wrapper ----------------

def gin_forward(params, x, A, P, num_layers, use_batch_norm=True):
    num_nodes, f_in = x.shape
    num_graphs = P.shape[0]
    hidden = params["init_w"].shape[1]
    hidden_final = params["np_wg"].shape[1]
    num_classes = params["fin_w"].shape[1]

    # GINConv self-term folded into the adjacency: one matmul instead of matmul+add.
    a_hat = A + jnp.eye(num_nodes, dtype=jnp.float32)

    # Eval-mode BatchNorm1d of layer i (i>0) applied to the conv-i input:
    #   BN(h) = h * s + t,  s = gamma * rsqrt(var + eps),  t = beta - mean * s
    layer_args = []
    apply_bn = []
    ones = jnp.ones((1, hidden), jnp.float32)
    zeros = jnp.zeros((1, hidden), jnp.float32)
    for i in range(num_layers):
        lp = params["layers"][i]
        if use_batch_norm and i > 0:
            s = lp["gamma"] * jax.lax.rsqrt(lp["var"] + 1e-5)
            t = lp["beta"] - lp["mean"] * s
            bn_s, bn_t = s.reshape(1, -1), t.reshape(1, -1)
            apply_bn.append(True)
        else:
            bn_s, bn_t = ones, zeros   # unused (statically skipped in kernel)
            apply_bn.append(False)
        layer_args += [lp["w1"], lp["b1"].reshape(1, -1),
                       lp["w2"], lp["b2"].reshape(1, -1),
                       bn_s, bn_t,
                       lp["fe_wg"], lp["fe_bg"].reshape(1, -1), lp["fe_wl"]]

    args = [x, a_hat, P,
            params["np_wg"], params["np_bg"].reshape(1, -1), params["np_wl"],
            params["init_w"], params["init_b"].reshape(1, -1),
            *layer_args,
            params["aft_w"], params["aft_b"].reshape(1, -1),
            params["fin_w"], params["fin_b"].reshape(1, -1)]

    # advisory cost estimate so XLA schedules the fused custom call sensibly
    mm = lambda m, k, n: 2 * m * k * n
    flops = (mm(num_graphs, num_nodes, f_in)                       # no_prop pool
             + mm(num_graphs, f_in, hidden_final)
             + mm(num_graphs, hidden_final, hidden_final)
             + mm(num_nodes, f_in, hidden))                        # initial lin
    flops += num_layers * (mm(num_nodes, num_nodes, hidden)        # (A+I)@h
                           + 2 * mm(num_nodes, hidden, hidden)     # lin_1, lin_2
                           + 2 * num_nodes * hidden                # BN affine
                           + mm(num_graphs, num_nodes, hidden)     # pool
                           + mm(num_graphs, hidden, hidden_final)
                           + mm(num_graphs, hidden_final, hidden_final))
    flops += (mm(num_graphs, hidden_final, hidden_final)           # after_conv
              + mm(num_graphs, hidden_final, num_classes))         # final_lin
    bytes_accessed = (sum(int(a.size) * a.dtype.itemsize for a in args)
                      + num_graphs * num_classes * 4)

    kern = functools.partial(_gin_fused_kernel, num_layers=num_layers,
                             apply_bn=tuple(apply_bn))
    return pl.pallas_call(
        kern,
        in_specs=[VMEM_SPEC] * len(args),
        out_specs=VMEM_SPEC,
        out_shape=jax.ShapeDtypeStruct((num_graphs, num_classes), jnp.float32),
        cost_estimate=pl.CostEstimate(
            flops=flops,
            transcendentals=num_graphs * num_classes,
            bytes_accessed=bytes_accessed),
    )(*args)


# ---------------- deterministic parameter init ----------------

def _init_linear(key, fan_in, fan_out, bias=True):
    bound = 1.0 / (fan_in ** 0.5)
    kw, kb = jax.random.split(key)
    w = jax.random.uniform(kw, (fan_in, fan_out), jnp.float32, -bound, bound)
    b = (jax.random.uniform(kb, (fan_out,), jnp.float32, -bound, bound)
         if bias else None)
    return w, b


def make_params(key, f_in, hidden, hidden_final, num_classes, num_layers):
    keys = iter(jax.random.split(key, 8 + 8 * num_layers))
    params = {}
    # no_prop FeatureExtractor
    params["np_wg"], params["np_bg"] = _init_linear(next(keys), f_in, hidden_final)
    params["np_wl"], _ = _init_linear(next(keys), hidden_final, hidden_final, bias=False)
    # initial_lin_x
    params["init_w"], params["init_b"] = _init_linear(next(keys), f_in, hidden)
    # per-layer
    layers = []
    for _ in range(num_layers):
        lp = {}
        lp["w1"], lp["b1"] = _init_linear(next(keys), hidden, hidden)
        lp["w2"], lp["b2"] = _init_linear(next(keys), hidden, hidden)
        lp["fe_wg"], lp["fe_bg"] = _init_linear(next(keys), hidden, hidden_final)
        lp["fe_wl"], _ = _init_linear(next(keys), hidden_final, hidden_final, bias=False)
        lp["gamma"] = jnp.ones((hidden,), jnp.float32)
        lp["beta"] = jnp.zeros((hidden,), jnp.float32)
        lp["mean"] = jnp.zeros((hidden,), jnp.float32)
        lp["var"] = jnp.ones((hidden,), jnp.float32)
        layers.append(lp)
    params["layers"] = layers
    # after_conv + final_lin
    params["aft_w"], params["aft_b"] = _init_linear(next(keys), hidden_final, hidden_final)
    params["fin_w"], params["fin_b"] = _init_linear(next(keys), hidden_final, num_classes)
    return params


if __name__ == "__main__":
    NUM_NODES, F_IN, HIDDEN, HIDDEN_FINAL, NUM_CLASSES, NUM_LAYERS = 16, 8, 16, 32, 4, 2
    NUM_GRAPHS = 2

    key = jax.random.PRNGKey(0)
    k_x, k_p = jax.random.split(key)

    # node features
    x = jax.random.normal(k_x, (NUM_NODES, F_IN), jnp.float32)

    # batch assignment: 8 nodes per graph
    batch = jnp.array([0] * 8 + [1] * 8, dtype=jnp.int32)

    # ring edges within each graph, both directions (undirected)
    src, dst = [], []
    for g in range(NUM_GRAPHS):
        base = g * 8
        for i in range(8):
            a, b = base + i, base + (i + 1) % 8
            src += [a, b]
            dst += [b, a]
    edge_index = jnp.array([src, dst], dtype=jnp.int32)

    # dense aggregation matrix A[i, j] = #edges j -> i  (GINConv "add" agg)
    A = jnp.zeros((NUM_NODES, NUM_NODES), jnp.float32)
    A = A.at[edge_index[1], edge_index[0]].add(1.0)

    # mean-pooling matrix P[g, i] = 1/n_g for nodes of graph g
    one_hot = (batch[None, :] == jnp.arange(NUM_GRAPHS)[:, None]).astype(jnp.float32)
    counts = one_hot.sum(axis=1, keepdims=True)
    P = one_hot / counts

    params = make_params(k_p, F_IN, HIDDEN, HIDDEN_FINAL, NUM_CLASSES, NUM_LAYERS)

    log_probs = gin_forward(params, x, A, P, NUM_LAYERS, use_batch_norm=True)
    jax.block_until_ready(log_probs)

    assert log_probs.shape == (NUM_GRAPHS, NUM_CLASSES)
    # rows of log_softmax should exp-sum to 1
    assert bool(jnp.allclose(jnp.exp(log_probs).sum(-1), 1.0, atol=1e-5))
    print("KERNEL_OK")
</pallas_src>

<mosaic_0001>
module attributes {stable_mosaic.version = 11 : i64} {
  func.func @_gin_fused_kernel(%arg0: memref<16x8xf32, #tpu.memory_space<vmem>>, %arg1: memref<16x16xf32, #tpu.memory_space<vmem>>, %arg2: memref<2x16xf32, #tpu.memory_space<vmem>>, %arg3: memref<8x32xf32, #tpu.memory_space<vmem>>, %arg4: memref<1x32xf32, #tpu.memory_space<vmem>>, %arg5: memref<32x32xf32, #tpu.memory_space<vmem>>, %arg6: memref<8x16xf32, #tpu.memory_space<vmem>>, %arg7: memref<1x16xf32, #tpu.memory_space<vmem>>, %arg8: memref<16x16xf32, #tpu.memory_space<vmem>>, %arg9: memref<1x16xf32, #tpu.memory_space<vmem>>, %arg10: memref<16x16xf32, #tpu.memory_space<vmem>>, %arg11: memref<1x16xf32, #tpu.memory_space<vmem>>, %arg12: memref<1x16xf32, #tpu.memory_space<vmem>>, %arg13: memref<1x16xf32, #tpu.memory_space<vmem>>, %arg14: memref<16x32xf32, #tpu.memory_space<vmem>>, %arg15: memref<1x32xf32, #tpu.memory_space<vmem>>, %arg16: memref<32x32xf32, #tpu.memory_space<vmem>>, %arg17: memref<16x16xf32, #tpu.memory_space<vmem>>, %arg18: memref<1x16xf32, #tpu.memory_space<vmem>>, %arg19: memref<16x16xf32, #tpu.memory_space<vmem>>, %arg20: memref<1x16xf32, #tpu.memory_space<vmem>>, %arg21: memref<1x16xf32, #tpu.memory_space<vmem>>, %arg22: memref<1x16xf32, #tpu.memory_space<vmem>>, %arg23: memref<16x32xf32, #tpu.memory_space<vmem>>, %arg24: memref<1x32xf32, #tpu.memory_space<vmem>>, %arg25: memref<32x32xf32, #tpu.memory_space<vmem>>, %arg26: memref<32x32xf32, #tpu.memory_space<vmem>>, %arg27: memref<1x32xf32, #tpu.memory_space<vmem>>, %arg28: memref<32x4xf32, #tpu.memory_space<vmem>>, %arg29: memref<1x4xf32, #tpu.memory_space<vmem>>, %arg30: memref<2x4xf32, #tpu.memory_space<vmem>>) attributes {dimension_semantics = [], scalar_prefetch = 0 : i64, scratch_operands = 0 : i64, tpu.core_type = #tpu.core_type<tc>} {
    %c0 = arith.constant 0 : index
    %c0_0 = arith.constant 0 : index
    %0 = vector.load %arg0[%c0, %c0_0] : memref<16x8xf32, #tpu.memory_space<vmem>>, vector<16x8xf32>
    %c0_1 = arith.constant 0 : index
    %c0_2 = arith.constant 0 : index
    %1 = vector.load %arg1[%c0_1, %c0_2] : memref<16x16xf32, #tpu.memory_space<vmem>>, vector<16x16xf32>
    %c0_3 = arith.constant 0 : index
    %c0_4 = arith.constant 0 : index
    %2 = vector.load %arg2[%c0_3, %c0_4] : memref<2x16xf32, #tpu.memory_space<vmem>>, vector<2x16xf32>
    %cst = arith.constant dense<0.000000e+00> : vector<2x8xf32>
    %3 = tpu.matmul %2, %0, %cst {dimension_numbers = #tpu.dot_dimension_numbers<[1], [0], [0], [1], [0, 0, 1, 1], [], []>} : vector<2x16xf32>, vector<16x8xf32>, vector<2x8xf32> -> vector<2x8xf32>
    %c0_5 = arith.constant 0 : index
    %c0_6 = arith.constant 0 : index
    %4 = vector.load %arg3[%c0_5, %c0_6] : memref<8x32xf32, #tpu.memory_space<vmem>>, vector<8x32xf32>
    %cst_7 = arith.constant dense<0.000000e+00> : vector<2x32xf32>
    %5 = tpu.matmul %3, %4, %cst_7 {dimension_numbers = #tpu.dot_dimension_numbers<[1], [0], [0], [1], [0, 0, 1, 1], [], []>} : vector<2x8xf32>, vector<8x32xf32>, vector<2x32xf32> -> vector<2x32xf32>
    %c0_8 = arith.constant 0 : index
    %c0_9 = arith.constant 0 : index
    %6 = vector.load %arg4[%c0_8, %c0_9] : memref<1x32xf32, #tpu.memory_space<vmem>>, vector<1x32xf32>
    %7 = vector.broadcast %6 : vector<1x32xf32> to vector<2x32xf32>
    %8 = arith.addf %5, %7 : vector<2x32xf32>
    %cst_10 = arith.constant 0.000000e+00 : f32
    %9 = vector.broadcast %cst_10 : f32 to vector<2x32xf32>
    %10 = arith.maximumf %8, %9 : vector<2x32xf32>
    %c0_11 = arith.constant 0 : index
    %c0_12 = arith.constant 0 : index
    %11 = vector.load %arg5[%c0_11, %c0_12] : memref<32x32xf32, #tpu.memory_space<vmem>>, vector<32x32xf32>
    %cst_13 = arith.constant dense<0.000000e+00> : vector<2x32xf32>
    %12 = tpu.matmul %10, %11, %cst_13 {dimension_numbers = #tpu.dot_dimension_numbers<[1], [0], [0], [1], [0, 0, 1, 1], [], []>} : vector<2x32xf32>, vector<32x32xf32>, vector<2x32xf32> -> vector<2x32xf32>
    %13 = arith.addf %8, %12 : vector<2x32xf32>
    %c0_14 = arith.constant 0 : index
    %c0_15 = arith.constant 0 : index
    %14 = vector.load %arg6[%c0_14, %c0_15] : memref<8x16xf32, #tpu.memory_space<vmem>>, vector<8x16xf32>
    %cst_16 = arith.constant dense<0.000000e+00> : vector<16x16xf32>
    %15 = tpu.matmul %0, %14, %cst_16 {dimension_numbers = #tpu.dot_dimension_numbers<[1], [0], [0], [1], [0, 0, 1, 1], [], []>} : vector<16x8xf32>, vector<8x16xf32>, vector<16x16xf32> -> vector<16x16xf32>
    %c0_17 = arith.constant 0 : index
    %c0_18 = arith.constant 0 : index
    %16 = vector.load %arg7[%c0_17, %c0_18] : memref<1x16xf32, #tpu.memory_space<vmem>>, vector<1x16xf32>
    %17 = vector.broadcast %16 : vector<1x16xf32> to vector<16x16xf32>
    %18 = arith.addf %15, %17 : vector<16x16xf32>
    %cst_19 = arith.constant dense<0.000000e+00> : vector<16x16xf32>
    %19 = tpu.matmul %1, %18, %cst_19 {dimension_numbers = #tpu.dot_dimension_numbers<[1], [0], [0], [1], [0, 0, 1, 1], [], []>} : vector<16x16xf32>, vector<16x16xf32>, vector<16x16xf32> -> vector<16x16xf32>
    %c0_20 = arith.constant 0 : index
    %c0_21 = arith.constant 0 : index
    %20 = vector.load %arg8[%c0_20, %c0_21] : memref<16x16xf32, #tpu.memory_space<vmem>>, vector<16x16xf32>
    %cst_22 = arith.constant dense<0.000000e+00> : vector<16x16xf32>
    %21 = tpu.matmul %19, %20, %cst_22 {dimension_numbers = #tpu.dot_dimension_numbers<[1], [0], [0], [1], [0, 0, 1, 1], [], []>} : vector<16x16xf32>, vector<16x16xf32>, vector<16x16xf32> -> vector<16x16xf32>
    %c0_23 = arith.constant 0 : index
    %c0_24 = arith.constant 0 : index
    %22 = vector.load %arg9[%c0_23, %c0_24] : memref<1x16xf32, #tpu.memory_space<vmem>>, vector<1x16xf32>
    %23 = vector.broadcast %22 : vector<1x16xf32> to vector<16x16xf32>
    %24 = arith.addf %21, %23 : vector<16x16xf32>
    %cst_25 = arith.constant 0.000000e+00 : f32
    %25 = vector.broadcast %cst_25 : f32 to vector<16x16xf32>
    %26 = arith.maximumf %24, %25 : vector<16x16xf32>
    %27 = arith.addf %19, %26 : vector<16x16xf32>
    %c0_26 = arith.constant 0 : index
    %c0_27 = arith.constant 0 : index
    %28 = vector.load %arg10[%c0_26, %c0_27] : memref<16x16xf32, #tpu.memory_space<vmem>>, vector<16x16xf32>
    %cst_28 = arith.constant dense<0.000000e+00> : vector<16x16xf32>
    %29 = tpu.matmul %27, %28, %cst_28 {dimension_numbers = #tpu.dot_dimension_numbers<[1], [0], [0], [1], [0, 0, 1, 1], [], []>} : vector<16x16xf32>, vector<16x16xf32>, vector<16x16xf32> -> vector<16x16xf32>
    %c0_29 = arith.constant 0 : index
    %c0_30 = arith.constant 0 : index
    %30 = vector.load %arg11[%c0_29, %c0_30] : memref<1x16xf32, #tpu.memory_space<vmem>>, vector<1x16xf32>
    %31 = vector.broadcast %30 : vector<1x16xf32> to vector<16x16xf32>
    %32 = arith.addf %29, %31 : vector<16x16xf32>
    %cst_31 = arith.constant dense<0.000000e+00> : vector<2x16xf32>
    %33 = tpu.matmul %2, %32, %cst_31 {dimension_numbers = #tpu.dot_dimension_numbers<[1], [0], [0], [1], [0, 0, 1, 1], [], []>} : vector<2x16xf32>, vector<16x16xf32>, vector<2x16xf32> -> vector<2x16xf32>
    %c0_32 = arith.constant 0 : index
    %c0_33 = arith.constant 0 : index
    %34 = vector.load %arg14[%c0_32, %c0_33] : memref<16x32xf32, #tpu.memory_space<vmem>>, vector<16x32xf32>
    %cst_34 = arith.constant dense<0.000000e+00> : vector<2x32xf32>
    %35 = tpu.matmul %33, %34, %cst_34 {dimension_numbers = #tpu.dot_dimension_numbers<[1], [0], [0], [1], [0, 0, 1, 1], [], []>} : vector<2x16xf32>, vector<16x32xf32>, vector<2x32xf32> -> vector<2x32xf32>
    %c0_35 = arith.constant 0 : index
    %c0_36 = arith.constant 0 : index
    %36 = vector.load %arg15[%c0_35, %c0_36] : memref<1x32xf32, #tpu.memory_space<vmem>>, vector<1x32xf32>
    %37 = vector.broadcast %36 : vector<1x32xf32> to vector<2x32xf32>
    %38 = arith.addf %35, %37 : vector<2x32xf32>
    %cst_37 = arith.constant 0.000000e+00 : f32
    %39 = vector.broadcast %cst_37 : f32 to vector<2x32xf32>
    %40 = arith.maximumf %38, %39 : vector<2x32xf32>
    %c0_38 = arith.constant 0 : index
    %c0_39 = arith.constant 0 : index
    %41 = vector.load %arg16[%c0_38, %c0_39] : memref<32x32xf32, #tpu.memory_space<vmem>>, vector<32x32xf32>
    %cst_40 = arith.constant dense<0.000000e+00> : vector<2x32xf32>
    %42 = tpu.matmul %40, %41, %cst_40 {dimension_numbers = #tpu.dot_dimension_numbers<[1], [0], [0], [1], [0, 0, 1, 1], [], []>} : vector<2x32xf32>, vector<32x32xf32>, vector<2x32xf32> -> vector<2x32xf32>
    %43 = arith.addf %38, %42 : vector<2x32xf32>
    %44 = arith.addf %13, %43 : vector<2x32xf32>
    %c0_41 = arith.constant 0 : index
    %c0_42 = arith.constant 0 : index
    %45 = vector.load %arg21[%c0_41, %c0_42] : memref<1x16xf32, #tpu.memory_space<vmem>>, vector<1x16xf32>
    %46 = vector.broadcast %45 : vector<1x16xf32> to vector<16x16xf32>
    %47 = arith.mulf %32, %46 : vector<16x16xf32>
    %c0_43 = arith.constant 0 : index
    %c0_44 = arith.constant 0 : index
    %48 = vector.load %arg22[%c0_43, %c0_44] : memref<1x16xf32, #tpu.memory_space<vmem>>, vector<1x16xf32>
    %49 = vector.broadcast %48 : vector<1x16xf32> to vector<16x16xf32>
    %50 = arith.addf %47, %49 : vector<16x16xf32>
    %cst_45 = arith.constant dense<0.000000e+00> : vector<16x16xf32>
    %51 = tpu.matmul %1, %50, %cst_45 {dimension_numbers = #tpu.dot_dimension_numbers<[1], [0], [0], [1], [0, 0, 1, 1], [], []>} : vector<16x16xf32>, vector<16x16xf32>, vector<16x16xf32> -> vector<16x16xf32>
    %c0_46 = arith.constant 0 : index
    %c0_47 = arith.constant 0 : index
    %52 = vector.load %arg17[%c0_46, %c0_47] : memref<16x16xf32, #tpu.memory_space<vmem>>, vector<16x16xf32>
    %cst_48 = arith.constant dense<0.000000e+00> : vector<16x16xf32>
    %53 = tpu.matmul %51, %52, %cst_48 {dimension_numbers = #tpu.dot_dimension_numbers<[1], [0], [0], [1], [0, 0, 1, 1], [], []>} : vector<16x16xf32>, vector<16x16xf32>, vector<16x16xf32> -> vector<16x16xf32>
    %c0_49 = arith.constant 0 : index
    %c0_50 = arith.constant 0 : index
    %54 = vector.load %arg18[%c0_49, %c0_50] : memref<1x16xf32, #tpu.memory_space<vmem>>, vector<1x16xf32>
    %55 = vector.broadcast %54 : vector<1x16xf32> to vector<16x16xf32>
    %56 = arith.addf %53, %55 : vector<16x16xf32>
    %cst_51 = arith.constant 0.000000e+00 : f32
    %57 = vector.broadcast %cst_51 : f32 to vector<16x16xf32>
    %58 = arith.maximumf %56, %57 : vector<16x16xf32>
    %59 = arith.addf %51, %58 : vector<16x16xf32>
    %c0_52 = arith.constant 0 : index
    %c0_53 = arith.constant 0 : index
    %60 = vector.load %arg19[%c0_52, %c0_53] : memref<16x16xf32, #tpu.memory_space<vmem>>, vector<16x16xf32>
    %cst_54 = arith.constant dense<0.000000e+00> : vector<16x16xf32>
    %61 = tpu.matmul %59, %60, %cst_54 {dimension_numbers = #tpu.dot_dimension_numbers<[1], [0], [0], [1], [0, 0, 1, 1], [], []>} : vector<16x16xf32>, vector<16x16xf32>, vector<16x16xf32> -> vector<16x16xf32>
    %c0_55 = arith.constant 0 : index
    %c0_56 = arith.constant 0 : index
    %62 = vector.load %arg20[%c0_55, %c0_56] : memref<1x16xf32, #tpu.memory_space<vmem>>, vector<1x16xf32>
    %63 = vector.broadcast %62 : vector<1x16xf32> to vector<16x16xf32>
    %64 = arith.addf %61, %63 : vector<16x16xf32>
    %cst_57 = arith.constant dense<0.000000e+00> : vector<2x16xf32>
    %65 = tpu.matmul %2, %64, %cst_57 {dimension_numbers = #tpu.dot_dimension_numbers<[1], [0], [0], [1], [0, 0, 1, 1], [], []>} : vector<2x16xf32>, vector<16x16xf32>, vector<2x16xf32> -> vector<2x16xf32>
    %c0_58 = arith.constant 0 : index
    %c0_59 = arith.constant 0 : index
    %66 = vector.load %arg23[%c0_58, %c0_59] : memref<16x32xf32, #tpu.memory_space<vmem>>, vector<16x32xf32>
    %cst_60 = arith.constant dense<0.000000e+00> : vector<2x32xf32>
    %67 = tpu.matmul %65, %66, %cst_60 {dimension_numbers = #tpu.dot_dimension_numbers<[1], [0], [0], [1], [0, 0, 1, 1], [], []>} : vector<2x16xf32>, vector<16x32xf32>, vector<2x32xf32> -> vector<2x32xf32>
    %c0_61 = arith.constant 0 : index
    %c0_62 = arith.constant 0 : index
    %68 = vector.load %arg24[%c0_61, %c0_62] : memref<1x32xf32, #tpu.memory_space<vmem>>, vector<1x32xf32>
    %69 = vector.broadcast %68 : vector<1x32xf32> to vector<2x32xf32>
    %70 = arith.addf %67, %69 : vector<2x32xf32>
    %cst_63 = arith.constant 0.000000e+00 : f32
    %71 = vector.broadcast %cst_63 : f32 to vector<2x32xf32>
    %72 = arith.maximumf %70, %71 : vector<2x32xf32>
    %c0_64 = arith.constant 0 : index
    %c0_65 = arith.constant 0 : index
    %73 = vector.load %arg25[%c0_64, %c0_65] : memref<32x32xf32, #tpu.memory_space<vmem>>, vector<32x32xf32>
    %cst_66 = arith.constant dense<0.000000e+00> : vector<2x32xf32>
    %74 = tpu.matmul %72, %73, %cst_66 {dimension_numbers = #tpu.dot_dimension_numbers<[1], [0], [0], [1], [0, 0, 1, 1], [], []>} : vector<2x32xf32>, vector<32x32xf32>, vector<2x32xf32> -> vector<2x32xf32>
    %75 = arith.addf %70, %74 : vector<2x32xf32>
    %76 = arith.addf %44, %75 : vector<2x32xf32>
    %cst_67 = arith.constant 0.000000e+00 : f32
    %77 = vector.broadcast %cst_67 : f32 to vector<2x32xf32>
    %78 = arith.maximumf %76, %77 : vector<2x32xf32>
    %cst_68 = arith.constant 5.000000e-01 : f32
    %79 = vector.broadcast %cst_68 : f32 to vector<2x32xf32>
    %80 = arith.mulf %78, %79 : vector<2x32xf32>
    %c0_69 = arith.constant 0 : index
    %c0_70 = arith.constant 0 : index
    %81 = vector.load %arg26[%c0_69, %c0_70] : memref<32x32xf32, #tpu.memory_space<vmem>>, vector<32x32xf32>
    %cst_71 = arith.constant dense<0.000000e+00> : vector<2x32xf32>
    %82 = tpu.matmul %80, %81, %cst_71 {dimension_numbers = #tpu.dot_dimension_numbers<[1], [0], [0], [1], [0, 0, 1, 1], [], []>} : vector<2x32xf32>, vector<32x32xf32>, vector<2x32xf32> -> vector<2x32xf32>
    %c0_72 = arith.constant 0 : index
    %c0_73 = arith.constant 0 : index
    %83 = vector.load %arg27[%c0_72, %c0_73] : memref<1x32xf32, #tpu.memory_space<vmem>>, vector<1x32xf32>
    %84 = vector.broadcast %83 : vector<1x32xf32> to vector<2x32xf32>
    %85 = arith.addf %82, %84 : vector<2x32xf32>
    %cst_74 = arith.constant 0.000000e+00 : f32
    %86 = vector.broadcast %cst_74 : f32 to vector<2x32xf32>
    %87 = arith.maximumf %85, %86 : vector<2x32xf32>
    %88 = arith.addf %87, %80 : vector<2x32xf32>
    %c0_75 = arith.constant 0 : index
    %c0_76 = arith.constant 0 : index
    %89 = vector.load %arg28[%c0_75, %c0_76] : memref<32x4xf32, #tpu.memory_space<vmem>>, vector<32x4xf32>
    %cst_77 = arith.constant dense<0.000000e+00> : vector<2x4xf32>
    %90 = tpu.matmul %88, %89, %cst_77 {dimension_numbers = #tpu.dot_dimension_numbers<[1], [0], [0], [1], [0, 0, 1, 1], [], []>} : vector<2x32xf32>, vector<32x4xf32>, vector<2x4xf32> -> vector<2x4xf32>
    %c0_78 = arith.constant 0 : index
    %c0_79 = arith.constant 0 : index
    %91 = vector.load %arg29[%c0_78, %c0_79] : memref<1x4xf32, #tpu.memory_space<vmem>>, vector<1x4xf32>
    %92 = vector.broadcast %91 : vector<1x4xf32> to vector<2x4xf32>
    %93 = arith.addf %90, %92 : vector<2x4xf32>
    %cst_80 = arith.constant dense<0xFF800000> : vector<2xf32>
    %94 = vector.multi_reduction <maximumf>, %93, %cst_80 [1] : vector<2x4xf32> to vector<2xf32>
    %95 = vector.shape_cast %94 : vector<2xf32> to vector<2x1xf32>
    %96 = vector.broadcast %95 : vector<2x1xf32> to vector<2x4xf32>
    %97 = arith.subf %93, %96 : vector<2x4xf32>
    %98 = math.exp %97 : vector<2x4xf32>
    %cst_81 = arith.constant dense<0.000000e+00> : vector<2xf32>
    %99 = vector.multi_reduction <add>, %98, %cst_81 [1] : vector<2x4xf32> to vector<2xf32>
    %100 = vector.shape_cast %99 : vector<2xf32> to vector<2x1xf32>
    %101 = math.log %100 : vector<2x1xf32>
    %102 = vector.broadcast %101 : vector<2x1xf32> to vector<2x4xf32>
    %103 = arith.subf %97, %102 : vector<2x4xf32>
    %c0_82 = arith.constant 0 : index
    %c0_83 = arith.constant 0 : index
    %104 = vector.load %arg30[%c0_82, %c0_83] : memref<2x4xf32, #tpu.memory_space<vmem>>, vector<2x4xf32>
    tpu.vector_store %arg30[%c0_82, %c0_83], %103 {strides = array<i32>} : memref<2x4xf32, #tpu.memory_space<vmem>>, vector<2x4xf32>,
    return
  }
}

</mosaic_0001>

<bundles_post_ra>
// kernel: tpu_custom_call.1
= control target key start
LH: loop header
LB: loop body
LE: loop exit
PB: predicated region body
PF: predicated region fallthrough
CT: control target
= control target key end

     0   :  { %s2779_s6 = smov 1   ;;  %s2780_s10 = smov 2   ;;  %s3227_s0 = inlined_call_operand.smem [shape: u32[31], index: -1, kind: input, shape index: {}] }
   0x1   :  { %s2842_s5 = sld [smem:[%s3227_s0]]   ;;  %s2781_s14 = smov 3  }
   0x2   :  { %s2847_s9 = sld [smem:[%s3227_s0 + %s2779_s6]]   ;;  %s2782_s18 = smov 4  }
   0x3   :  { %s2852_s13 = sld [smem:[%s3227_s0 + %s2780_s10]]   ;;  %s2783_s22 = smov 5  }
   0x4   :  { %s2857_s17 = sld [smem:[%s3227_s0 + %s2781_s14]]   ;;  %s2784_s26 = smov 6  }
   0x5   :  { %s2862_s21 = sld [smem:[%s3227_s0 + %s2782_s18]]   ;;  %s2785_s30 = smov 7  }
   0x6   :  { %s2867_s25 = sld [smem:[%s3227_s0 + %s2783_s22]]   ;;  %s2786_s4 = smov 8  }
   0x7   :  { %3239 = sst [smem:[#allocation44_spill]] %s2842_s5  ;;  %s2787_s10 = smov 9  }
   0x8   :  { %s2872_s29 = sld [smem:[%s3227_s0 + %s2784_s26]]   ;;  %s2788_s15 = smov 10  }
   0x9   :  { %s2877_s3 = sld [smem:[%s3227_s0 + %s2785_s30]]   ;;  %s2789_s20 = smov 11  }
   0xa   :  { %s2882_s8 = sld [smem:[%s3227_s0 + %s2786_s4]]   ;;  %s2790_s26 = smov 12  }
   0xb   :  { %s2887_s14 = sld [smem:[%s3227_s0 + %s2787_s10]]   ;;  %s2791_s1 = smov 13  }
   0xc   :  { %3240 = sst [smem:[#allocation45_spill]] %s2867_s25  ;;  %s2792_s7 = smov 14  }
   0xd   :  { %s2892_s19 = sld [smem:[%s3227_s0 + %s2788_s15]]   ;;  %s2793_s15 = smov 15  }
   0xe   :  { %s2897_s24 = sld [smem:[%s3227_s0 + %s2789_s20]]   ;;  %s2794_s22 = smov 16  }
   0xf   :  { %s2902_s30 = sld [smem:[%s3227_s0 + %s2790_s26]]   ;;  %s2795_s28 = smov 17  }
  0x10   :  { %s2907_s6 = sld [smem:[%s3227_s0 + %s2791_s1]]  }
  0x11   :  { %s2912_s12 = sld [smem:[%s3227_s0 + %s2792_s7]]   ;;  %s2796_s7 = smov 18  }
  0x12   :  { %s2917_s20 = sld [smem:[%s3227_s0 + %s2793_s15]]   ;;  %s2797_s15 = smov 19  }
  0x13   :  { %s2922_s27 = sld [smem:[%s3227_s0 + %s2794_s22]]   ;;  %s2798_s22 = smov 20  }
  0x14   :  { %s2927_s4 = sld [smem:[%s3227_s0 + %s2795_s28]]   ;;  %s2799_s28 = smov 21  }
  0x15   :  { %3241 = sst [smem:[#allocation46_spill]] %s2902_s30 }
  0x16   :  { %s2932_s25 = sld [smem:[%s3227_s0 + %s2796_s7]]   ;;  %s2800_s7 = smov 22  }
  0x17   :  { %3242 = sst [smem:[#allocation47_spill]] %s2912_s12 }
  0x18   :  { %s2937_s5 = sld [smem:[%s3227_s0 + %s2797_s15]]   ;;  %s2801_s15 = smov 23  }
  0x19   :  { %3243 = sst [smem:[#allocation48_spill]] %s2922_s27 }
  0x1a   :  { %3244 = sst [smem:[#allocation49_spill]] %s2927_s4 }
  0x1b   :  { %s2942_s27 = sld [smem:[%s3227_s0 + %s2798_s22]]   ;;  %s2802_s22 = smov 24  }
  0x1c   :  { %s2947_s4 = sld [smem:[%s3227_s0 + %s2799_s28]]   ;;  %s2803_s28 = smov 25  }
  0x1d   :  { %s2952_s12 = sld [smem:[%s3227_s0 + %s2800_s7]]   ;;  %s2804_s7 = smov 26  }
  0x1e   :  { %3245 = sst [smem:[#allocation50_spill]] %s2937_s5 }
  0x1f   :  { %s2957_s5 = sld [smem:[%s3227_s0 + %s2801_s15]]   ;;  %s2805_s15 = smov 27  }
  0x20   :  { %s2972_s30 = sld [smem:[%s3227_s0 + %s2804_s7]]   ;;  %s2808_s7 = smov 30  }
  0x21   :  { %3246 = sst [smem:[#allocation51_spill]] %s2942_s27 }
  0x22   :  { %3247 = sst [smem:[#allocation52_spill]] %s2947_s4 }
  0x23   :  { %s2962_s27 = sld [smem:[%s3227_s0 + %s2802_s22]]   ;;  %s2806_s22 = smov 28  }
  0x24   :  { %s2967_s4 = sld [smem:[%s3227_s0 + %s2803_s28]]   ;;  %s2807_s28 = smov 29  }
  0x25   :  { %3248 = sst [smem:[#allocation53_spill]] %s2957_s5 }
  0x26   :  { %3251 = sst [smem:[#allocation56_spill]] %s2972_s30 }
  0x27   :  { %s2977_s5 = sld [smem:[%s3227_s0 + %s2805_s15]]  }
  0x28   :  { %s2992_s30 = sld [smem:[%s3227_s0 + %s2808_s7]]  }
  0x29   :  { %3249 = sst [smem:[#allocation54_spill]] %s2962_s27 }
  0x2a   :  { %3250 = sst [smem:[#allocation55_spill]] %s2967_s4 }
  0x2b   :  { %s2982_s27 = sld [smem:[%s3227_s0 + %s2806_s22]]  }
  0x2c   :  { %s2987_s4 = sld [smem:[%s3227_s0 + %s2807_s28]]  }
  0x2d   :  { %66 = vsyncpa [#allocation3], 0 }
  0x2e   :  { %67 = vsyncpa [#allocation6], 0 }
  0x2f   :  { %68 = vsyncpa [#allocation9], 0 }
  0x30   :  { %69 = vsyncpa [#allocation12], 0 }
  0x31   :  { %70 = vsyncpa [#allocation15], 0 }
  0x32   :  { %71 = vsyncpa [#allocation18], 0 }
  0x33   :  { %72 = vsyncpa [#allocation21], 0 }
  0x34   :  { %73 = vsyncpa [#allocation24], 0 }
  0x35   :  { %74 = vsyncpa [#allocation27], 0 }
  0x36   :  { %75 = vsyncpa [#allocation30], 0 }
  0x37   :  { %76 = vsyncpa [#allocation4], 0  ;;  %s2809_s15 = smov [#allocation5]   ;;  %s2810_s18 = smov [#allocation8]  }
  0x38   :  { %s97_s16 = sshll.u32 %s2809_s15, 4  ;;  %s117_s22 = sshll.u32 %s2810_s18, 4  ;;  %s98_s16 = int_to_ptr.vmem [resolvable:$true] %s97_s16  ;;  %s118_s22 = int_to_ptr.vmem [resolvable:$true] %s117_s22 }
  0x39   :  { %s2317_s0 = scalar_lea.hbm %s2852_s13, 32 }
  0x3a   :  { %p2318_p0 = scmp.ne.s32.totalorder %s2852_s13, %s2317_s0  ;;  %p2321_p1 = scmp.lt.u32.totalorder %s2317_s0, %s2852_s13 }
  0x3c   :  { %p2323_p2 = pnand %p2321_p1, %p2318_p0 }
  0x3e   :  { %2326 = shalt.err (!%p2323_p2)
}
  0x3f   :  { %s2327_s23 = scalar_lea.vmem %s98_s16, 32  ;;  %p2332_p4 = scmp.lt.s32.totalorder %s98_s16, %s98_s16 }
  0x40   :  { %p2328_p3 = scmp.ne.s32.totalorder %s98_s16, %s2327_s23  ;;  %p2333_p5 = scmp.lt.s32.totalorder %s2327_s23, %s2327_s23 }
  0x42   :  { %p2334_p6 = por %p2333_p5, %p2332_p4 }
  0x44   :  { %p2335_p7 = pnand %p2334_p6, %p2328_p3 }
  0x46   :  { %2338 = shalt.err (!%p2335_p7)
}
  0x47   :  { %100 = dma.hbm_to_vmem [thread:$0]  %s2852_s13, 32, %s98_s16, [#allocation6]  }
  0x48   :  { %s2339_s26 = scalar_lea.hbm %s2862_s21, 16 }
  0x49   :  { %p2340_p8 = scmp.ne.s32.totalorder %s2862_s21, %s2339_s26  ;;  %p2343_p9 = scmp.lt.u32.totalorder %s2339_s26, %s2862_s21 }
  0x4b   :  { %p2345_p10 = pnand %p2343_p9, %p2340_p8 }
  0x4d   :  { %2348 = shalt.err (!%p2345_p10)
}
  0x4e   :  { %s2349_s28 = scalar_lea.vmem %s118_s22, 16  ;;  %s2353_s1 = scalar_lea.vmem %s118_s22, 32 }
  0x4f   :  { %p2350_p11 = scmp.ne.s32.totalorder %s118_s22, %s2349_s28  ;;  %p2354_p12 = scmp.lt.s32.totalorder %s118_s22, %s118_s22 }
  0x50   :  { %p2355_p13 = scmp.lt.s32.totalorder %s2353_s1, %s2349_s28 }
  0x52   :  { %p2356_p0 = por %p2355_p13, %p2354_p12 }
  0x54   :  { %p2357_p1 = pnand %p2356_p0, %p2350_p11 }
  0x56   :  { %2360 = shalt.err (!%p2357_p1)
}
  0x57   :  { %120 = dma.hbm_to_vmem [thread:$0]  %s2862_s21, 16, %s118_s22, [#allocation9]  }
  0x58   :  { %s2811_s2 = smov [#allocation11]   ;;  %s2812_s7 = smov [#allocation14]  }
  0x59   :  { %s139_s13 = sshll.u32 %s2811_s2, 4  ;;  %s161_s10 = sshll.u32 %s2812_s7, 4  ;;  %s140_s13 = int_to_ptr.vmem [resolvable:$true] %s139_s13  ;;  %s162_s10 = int_to_ptr.vmem [resolvable:$true] %s161_s10 }
  0x5a   :  { %s2361_s11 = scalar_lea.hbm %s2877_s3, 16 }
  0x5b   :  { %p2362_p2 = scmp.ne.s32.totalorder %s2877_s3, %s2361_s11  ;;  %p2365_p3 = scmp.lt.u32.totalorder %s2361_s11, %s2877_s3 }
  0x5d   :  { %p2367_p4 = pnand %p2365_p3, %p2362_p2 }
  0x5f   :  { %2370 = shalt.err (!%p2367_p4)
}
  0x60   :  { %s2371_s15 = scalar_lea.vmem %s140_s13, 16  ;;  %s2375_s16 = scalar_lea.vmem %s140_s13, 32 }
  0x61   :  { %p2372_p5 = scmp.ne.s32.totalorder %s140_s13, %s2371_s15  ;;  %p2376_p6 = scmp.lt.s32.totalorder %s140_s13, %s140_s13 }
  0x62   :  { %p2377_p7 = scmp.lt.s32.totalorder %s2375_s16, %s2371_s15 }
  0x64   :  { %p2378_p8 = por %p2377_p7, %p2376_p6 }
  0x66   :  { %p2379_p9 = pnand %p2378_p8, %p2372_p5 }
  0x68   :  { %2382 = shalt.err (!%p2379_p9)
}
  0x69   :  { %142 = dma.hbm_to_vmem [thread:$0]  %s2877_s3, 16, %s140_s13, [#allocation12]  }
  0x6a   :  { %s2383_s21 = scalar_lea.hbm %s2887_s14, 16 }
  0x6b   :  { %p2384_p10 = scmp.ne.s32.totalorder %s2887_s14, %s2383_s21  ;;  %p2387_p11 = scmp.lt.u32.totalorder %s2383_s21, %s2887_s14 }
  0x6d   :  { %p2389_p12 = pnand %p2387_p11, %p2384_p10 }
  0x6f   :  { %2392 = shalt.err (!%p2389_p12)
}
  0x70   :  { %s2393_s18 = scalar_lea.vmem %s162_s10, 16  ;;  %s2397_s22 = scalar_lea.vmem %s162_s10, 32 }
  0x71   :  { %p2394_p13 = scmp.ne.s32.totalorder %s162_s10, %s2393_s18  ;;  %p2398_p0 = scmp.lt.s32.totalorder %s162_s10, %s162_s10 }
  0x72   :  { %p2399_p1 = scmp.lt.s32.totalorder %s2397_s22, %s2393_s18 }
  0x74   :  { %p2400_p2 = por %p2399_p1, %p2398_p0 }
  0x76   :  { %p2401_p3 = pnand %p2400_p2, %p2394_p13 }
  0x78   :  { %2404 = shalt.err (!%p2401_p3)
}
  0x79   :  { %164 = dma.hbm_to_vmem [thread:$0]  %s2887_s14, 16, %s162_s10, [#allocation15]  }
  0x7a   :  { %s2813_s0 = smov [#allocation17]   ;;  %s2814_s23 = smov [#allocation20]  }
  0x7b   :  { %s183_s3 = sshll.u32 %s2813_s0, 4  ;;  %s203_s26 = sshll.u32 %s2814_s23, 4  ;;  %s184_s3 = int_to_ptr.vmem [resolvable:$true] %s183_s3  ;;  %s204_s26 = int_to_ptr.vmem [resolvable:$true] %s203_s26 }
  0x7c   :  { %s2405_s28 = scalar_lea.hbm %s2897_s24, 16 }
  0x7d   :  { %p2406_p4 = scmp.ne.s32.totalorder %s2897_s24, %s2405_s28  ;;  %p2409_p5 = scmp.lt.u32.totalorder %s2405_s28, %s2897_s24 }
  0x7f   :  { %p2411_p6 = pnand %p2409_p5, %p2406_p4 }
  0x81   :  { %2414 = shalt.err (!%p2411_p6)
}
  0x82   :  { %s2415_s1 = scalar_lea.vmem %s184_s3, 16  ;;  %s2419_s2 = scalar_lea.vmem %s184_s3, 32 }
  0x83   :  { %p2416_p7 = scmp.ne.s32.totalorder %s184_s3, %s2415_s1  ;;  %p2420_p8 = scmp.lt.s32.totalorder %s184_s3, %s184_s3 }
  0x84   :  { %p2421_p9 = scmp.lt.s32.totalorder %s2419_s2, %s2415_s1 }
  0x86   :  { %p2422_p10 = por %p2421_p9, %p2420_p8 }
  0x88   :  { %p2423_p11 = pnand %p2422_p10, %p2416_p7 }
  0x8a   :  { %2426 = shalt.err (!%p2423_p11)
}
  0x8b   :  { %186 = dma.hbm_to_vmem [thread:$0]  %s2897_s24, 16, %s184_s3, [#allocation18]  }
  0x8c   :  { %s2427_s14 = scalar_lea.hbm %s2907_s6, 16 }
  0x8d   :  { %p2428_p12 = scmp.ne.s32.totalorder %s2907_s6, %s2427_s14  ;;  %p2431_p13 = scmp.lt.u32.totalorder %s2427_s14, %s2907_s6 }
  0x8f   :  { %p2433_p0 = pnand %p2431_p13, %p2428_p12 }
  0x91   :  { %2436 = shalt.err (!%p2433_p0)
}
  0x92   :  { %s2437_s13 = scalar_lea.vmem %s204_s26, 16  ;;  %s2441_s7 = scalar_lea.vmem %s204_s26, 32 }
  0x93   :  { %p2438_p1 = scmp.ne.s32.totalorder %s204_s26, %s2437_s13  ;;  %p2442_p2 = scmp.lt.s32.totalorder %s204_s26, %s204_s26 }
  0x94   :  { %p2443_p3 = scmp.lt.s32.totalorder %s2441_s7, %s2437_s13 }
  0x96   :  { %p2444_p4 = por %p2443_p3, %p2442_p2 }
  0x98   :  { %p2445_p5 = pnand %p2444_p4, %p2438_p1 }
  0x9a   :  { %2448 = shalt.err (!%p2445_p5)
}
  0x9b   :  { %206 = dma.hbm_to_vmem [thread:$0]  %s2907_s6, 16, %s204_s26, [#allocation21]  }
  0x9c   :  { %s2815_s10 = smov [#allocation23]   ;;  %s2816_s11 = smov [#allocation26]  }
  0x9d   :  { %s225_s24 = sshll.u32 %s2815_s10, 4  ;;  %s249_s15 = sshll.u32 %s2816_s11, 4  ;;  %s226_s24 = int_to_ptr.vmem [resolvable:$true] %s225_s24  ;;  %s250_s15 = int_to_ptr.vmem [resolvable:$true] %s249_s15 }
  0x9e   :  { %s2449_s16 = scalar_lea.hbm %s2917_s20, 16 }
  0x9f   :  { %p2450_p6 = scmp.ne.s32.totalorder %s2917_s20, %s2449_s16  ;;  %p2453_p7 = scmp.lt.u32.totalorder %s2449_s16, %s2917_s20 }
  0xa1   :  { %p2455_p8 = pnand %p2453_p7, %p2450_p6 }
  0xa3   :  { %2458 = shalt.err (!%p2455_p8)
}
  0xa4   :  { %s2459_s21 = scalar_lea.vmem %s226_s24, 16  ;;  %s2463_s18 = scalar_lea.vmem %s226_s24, 32 }
  0xa5   :  { %p2460_p9 = scmp.ne.s32.totalorder %s226_s24, %s2459_s21  ;;  %p2464_p10 = scmp.lt.s32.totalorder %s226_s24, %s226_s24 }
  0xa6   :  { %p2465_p11 = scmp.lt.s32.totalorder %s2463_s18, %s2459_s21 }
  0xa8   :  { %p2466_p12 = por %p2465_p11, %p2464_p10 }
  0xaa   :  { %p2467_p13 = pnand %p2466_p12, %p2460_p9 }
  0xac   :  { %2470 = shalt.err (!%p2467_p13)
}
  0xad   :  { %228 = dma.hbm_to_vmem [thread:$0]  %s2917_s20, 16, %s226_s24, [#allocation24]  }
  0xae   :  { %s2471_s6 = scalar_lea.hbm %s2932_s25, 16 }
  0xaf   :  { %p2472_p0 = scmp.ne.s32.totalorder %s2932_s25, %s2471_s6  ;;  %p2475_p1 = scmp.lt.u32.totalorder %s2471_s6, %s2932_s25 }
  0xb1   :  { %p2477_p2 = pnand %p2475_p1, %p2472_p0 }
  0xb3   :  { %2480 = shalt.err (!%p2477_p2)
}
  0xb4   :  { %s2481_s22 = scalar_lea.vmem %s250_s15, 16  ;;  %s2485_s0 = scalar_lea.vmem %s250_s15, 32 }
  0xb5   :  { %p2482_p3 = scmp.ne.s32.totalorder %s250_s15, %s2481_s22  ;;  %p2486_p4 = scmp.lt.s32.totalorder %s250_s15, %s250_s15 }
  0xb6   :  { %p2487_p5 = scmp.lt.s32.totalorder %s2485_s0, %s2481_s22 }
  0xb8   :  { %p2488_p6 = por %p2487_p5, %p2486_p4 }
  0xba   :  { %p2489_p7 = pnand %p2488_p6, %p2482_p3 }
  0xbc   :  { %2492 = shalt.err (!%p2489_p7)
}
  0xbd   :  { %252 = dma.hbm_to_vmem [thread:$0]  %s2932_s25, 16, %s250_s15, [#allocation27]  }
  0xbe   :  { %s2817_s3 = smov [#allocation29]   ;;  %s2818_s23 = smov [#allocation2]  }
  0xbf   :  { %s275_s20 = sshll.u32 %s2817_s3, 4  ;;  %s84_s26 = sshll.u32 %s2818_s23, 4  ;;  %s276_s20 = int_to_ptr.vmem [resolvable:$true] %s275_s20  ;;  %s3026_s26 = int_to_ptr.vmem [resolvable:$true] %s84_s26 }
  0xc0   :  { %s2493_s28 = scalar_lea.hbm %s2952_s12, 16 }
  0xc1   :  { %p2494_p8 = scmp.ne.s32.totalorder %s2952_s12, %s2493_s28  ;;  %p2497_p9 = scmp.lt.u32.totalorder %s2493_s28, %s2952_s12 }
  0xc3   :  { %p2499_p10 = pnand %p2497_p9, %p2494_p8 }
  0xc5   :  { %2502 = shalt.err (!%p2499_p10)
}
  0xc6   :  { %s2503_s1 = scalar_lea.vmem %s276_s20, 16  ;;  %s2507_s2 = scalar_lea.vmem %s276_s20, 32 }
  0xc7   :  { %p2504_p11 = scmp.ne.s32.totalorder %s276_s20, %s2503_s1  ;;  %p2508_p12 = scmp.lt.s32.totalorder %s276_s20, %s276_s20 }
  0xc8   :  { %p2509_p13 = scmp.lt.s32.totalorder %s2507_s2, %s2503_s1 }
  0xca   :  { %p2510_p0 = por %p2509_p13, %p2508_p12 }
  0xcc   :  { %p2511_p1 = pnand %p2510_p0, %p2504_p11 }
  0xce   :  { %2514 = shalt.err (!%p2511_p1)
}
  0xcf   :  { %278 = dma.hbm_to_vmem [thread:$0]  %s2952_s12, 16, %s276_s20, [#allocation30]  }
  0xd0   :  { %s2515_s25 = scalar_lea.hbm %s2847_s9, 256 }
  0xd1   :  { %p2516_p2 = scmp.ne.s32.totalorder %s2847_s9, %s2515_s25  ;;  %p2519_p3 = scmp.lt.u32.totalorder %s2515_s25, %s2847_s9 }
  0xd3   :  { %p2521_p4 = pnand %p2519_p3, %p2516_p2 }
  0xd5   :  { %2524 = shalt.err (!%p2521_p4)
}
  0xd6   :  { %s2525_s14 = scalar_lea.vmem %s3026_s26, 256  ;;  %p2530_p6 = scmp.lt.s32.totalorder %s3026_s26, %s3026_s26 }
  0xd7   :  { %p2526_p5 = scmp.ne.s32.totalorder %s3026_s26, %s2525_s14  ;;  %p2531_p7 = scmp.lt.s32.totalorder %s2525_s14, %s2525_s14 }
  0xd9   :  { %p2532_p8 = por %p2531_p7, %p2530_p6 }
  0xdb   :  { %p2533_p9 = pnand %p2532_p8, %p2526_p5 }
  0xdd   :  { %2536 = shalt.err (!%p2533_p9)
}
  0xde   :  { %s2819_s13 = smov 128   ;;  %s2820_s12 = smov 8  }
  0xdf   :  { %90 = dma.hbm_to_vmem [thread:$0]  %s2847_s9, 256, %s3026_s26, [#allocation3], %s2819_s13, %s2819_s13, %s2820_s12  }
  0xe0   :  { %s2821_s7 = smov [#allocation7]   ;;  %s2822_s24 = smov [#allocation10]  }
  0xe1   :  { %s107_s10 = sshll.u32 %s2821_s7, 4  ;;  %s129_s11 = sshll.u32 %s2822_s24, 4  ;;  %s108_s10 = int_to_ptr.vmem [resolvable:$true] %s107_s10  ;;  %s130_s11 = int_to_ptr.vmem [resolvable:$true] %s129_s11 }
  0xe2   :  { %s2537_s15 = scalar_lea.hbm %s2857_s17, 128 }
  0xe3   :  { %p2538_p10 = scmp.ne.s32.totalorder %s2857_s17, %s2537_s15  ;;  %p2541_p11 = scmp.lt.u32.totalorder %s2537_s15, %s2857_s17 }
  0xe5   :  { %p2543_p12 = pnand %p2541_p11, %p2538_p10 }
  0xe7   :  { %2546 = shalt.err (!%p2543_p12)
}
  0xe8   :  { %s2547_s16 = scalar_lea.vmem %s108_s10, 128  ;;  %p2552_p0 = scmp.lt.s32.totalorder %s108_s10, %s108_s10 }
  0xe9   :  { %p2548_p13 = scmp.ne.s32.totalorder %s108_s10, %s2547_s16  ;;  %p2553_p1 = scmp.lt.s32.totalorder %s2547_s16, %s2547_s16 }
  0xeb   :  { %p2554_p2 = por %p2553_p1, %p2552_p0 }
  0xed   :  { %p2555_p3 = pnand %p2554_p2, %p2548_p13 }
  0xef   :  { %2558 = shalt.err (!%p2555_p3)
}
  0xf0   :  { %110 = dma.hbm_to_vmem [thread:$0]  %s2857_s17, 128, %s108_s10, [#allocation6]  }
  0xf1   :  { %s2559_s9 = scalar_lea.hbm %s2872_s29, 128 }
  0xf2   :  { %p2560_p4 = scmp.ne.s32.totalorder %s2872_s29, %s2559_s9  ;;  %p2563_p5 = scmp.lt.u32.totalorder %s2559_s9, %s2872_s29 }
  0xf4   :  { %p2565_p6 = pnand %p2563_p5, %p2560_p4 }
  0xf6   :  { %2568 = shalt.err (!%p2565_p6)
}
  0xf7   :  { %s2569_s21 = scalar_lea.vmem %s130_s11, 128  ;;  %p2574_p8 = scmp.lt.s32.totalorder %s130_s11, %s130_s11 }
  0xf8   :  { %p2570_p7 = scmp.ne.s32.totalorder %s130_s11, %s2569_s21  ;;  %p2575_p9 = scmp.lt.s32.totalorder %s2569_s21, %s2569_s21 }
  0xfa   :  { %p2576_p10 = por %p2575_p9, %p2574_p8 }
  0xfc   :  { %p2577_p11 = pnand %p2576_p10, %p2570_p7 }
  0xfe   :  { %2580 = shalt.err (!%p2577_p11)
}
  0xff   :  { %132 = dma.hbm_to_vmem [thread:$0]  %s2872_s29, 128, %s130_s11, [#allocation9]  }
 0x100   :  { %s2823_s18 = smov [#allocation13]   ;;  %s2824_s17 = smov [#allocation16]  }
 0x101   :  { %s148_s6 = sshll.u32 %s2823_s18, 4  ;;  %s170_s22 = sshll.u32 %s2824_s17, 4  ;;  %s149_s6 = int_to_ptr.vmem [resolvable:$true] %s148_s6  ;;  %s3052_s22 = int_to_ptr.vmem [resolvable:$true] %s170_s22 }
 0x102   :  { %s2581_s0 = scalar_lea.hbm %s2882_s8, 256 }
 0x103   :  { %p2582_p12 = scmp.ne.s32.totalorder %s2882_s8, %s2581_s0  ;;  %p2585_p13 = scmp.lt.u32.totalorder %s2581_s0, %s2882_s8 }
 0x105   :  { %p2587_p0 = pnand %p2585_p13, %p2582_p12 }
 0x107   :  { %2590 = shalt.err (!%p2587_p0)
}
 0x108   :  { %s2591_s3 = scalar_lea.vmem %s149_s6, 256  ;;  %p2596_p2 = scmp.lt.s32.totalorder %s149_s6, %s149_s6 }
 0x109   :  { %p2592_p1 = scmp.ne.s32.totalorder %s149_s6, %s2591_s3  ;;  %p2597_p3 = scmp.lt.s32.totalorder %s2591_s3, %s2591_s3 }
 0x10b   :  { %p2598_p4 = por %p2597_p3, %p2596_p2 }
 0x10d   :  { %p2599_p5 = pnand %p2598_p4, %p2592_p1 }
 0x10f   :  { %2602 = shalt.err (!%p2599_p5)
}
 0x110   :  { %154 = dma.hbm_to_vmem [thread:$0]  %s2882_s8, 256, %s149_s6, [#allocation12], %s2819_s13, %s2819_s13, %s2820_s12  }
 0x111   :  { %s2603_s29 = scalar_lea.hbm %s2892_s19, 256 }
 0x112   :  { %p2604_p6 = scmp.ne.s32.totalorder %s2892_s19, %s2603_s29  ;;  %p2607_p7 = scmp.lt.u32.totalorder %s2603_s29, %s2892_s19 }
 0x114   :  { %p2609_p8 = pnand %p2607_p7, %p2604_p6 }
 0x116   :  { %2612 = shalt.err (!%p2609_p8)
}
 0x117   :  { %s2613_s20 = scalar_lea.vmem %s3052_s22, 256  ;;  %p2618_p10 = scmp.lt.s32.totalorder %s3052_s22, %s3052_s22 }
 0x118   :  { %p2614_p9 = scmp.ne.s32.totalorder %s3052_s22, %s2613_s20  ;;  %p2619_p11 = scmp.lt.s32.totalorder %s2613_s20, %s2613_s20 }
 0x11a   :  { %p2620_p12 = por %p2619_p11, %p2618_p10 }
 0x11c   :  { %p2621_p13 = pnand %p2620_p12, %p2614_p9 }
 0x11e   :  { %2624 = shalt.err (!%p2621_p13)
}
 0x11f   :  { %s3252_s8 = sld [smem:[#allocation46_spill]]  ;;  %s2825_s23 = smov [#allocation19]  }
 0x120   :  { %176 = dma.hbm_to_vmem [thread:$0]  %s2892_s19, 256, %s3052_s22, [#allocation15], %s2819_s13, %s2819_s13, %s2820_s12  }
 0x121   :  { %s193_s26 = sshll.u32 %s2825_s23, 4  ;;  %s2826_s28 = smov [#allocation22]   ;;  %s194_s26 = int_to_ptr.vmem [resolvable:$true] %s193_s26 }
 0x122   :  { %s212_s1 = sshll.u32 %s2826_s28, 4  ;;  %s3073_s1 = int_to_ptr.vmem [resolvable:$true] %s212_s1 }
 0x125   :  { %s2625_s2 = scalar_lea.hbm %s3252_s8, 16 }
 0x126   :  { %p2626_p0 = scmp.ne.s32.totalorder %s3252_s8, %s2625_s2  ;;  %p2629_p1 = scmp.lt.u32.totalorder %s2625_s2, %s3252_s8 }
 0x128   :  { %p2631_p2 = pnand %p2629_p1, %p2626_p0 }
 0x12a   :  { %2634 = shalt.err (!%p2631_p2)
}
 0x12b   :  { %s2635_s25 = scalar_lea.vmem %s194_s26, 16  ;;  %s2639_s14 = scalar_lea.vmem %s194_s26, 32 }
 0x12c   :  { %p2636_p3 = scmp.ne.s32.totalorder %s194_s26, %s2635_s25  ;;  %p2640_p4 = scmp.lt.s32.totalorder %s194_s26, %s194_s26 }
 0x12d   :  { %p2641_p5 = scmp.lt.s32.totalorder %s2639_s14, %s2635_s25 }
 0x12f   :  { %p2642_p6 = por %p2641_p5, %p2640_p4 }
 0x131   :  { %p2643_p7 = pnand %p2642_p6, %p2636_p3 }
 0x133   :  { %2646 = shalt.err (!%p2643_p7)
}
 0x134   :  { %s3253_s19 = sld [smem:[#allocation47_spill]] }
 0x135   :  { %196 = dma.hbm_to_vmem [thread:$0]  %s3252_s8, 16, %s194_s26, [#allocation18]  }
 0x13a   :  { %s2647_s7 = scalar_lea.hbm %s3253_s19, 256 }
 0x13b   :  { %p2648_p8 = scmp.ne.s32.totalorder %s3253_s19, %s2647_s7  ;;  %p2651_p9 = scmp.lt.u32.totalorder %s2647_s7, %s3253_s19 }
 0x13d   :  { %p2653_p10 = pnand %p2651_p9, %p2648_p8 }
 0x13f   :  { %2656 = shalt.err (!%p2653_p10)
}
 0x140   :  { %s2657_s10 = scalar_lea.vmem %s3073_s1, 256  ;;  %p2662_p12 = scmp.lt.s32.totalorder %s3073_s1, %s3073_s1 }
 0x141   :  { %p2658_p11 = scmp.ne.s32.totalorder %s3073_s1, %s2657_s10  ;;  %p2663_p13 = scmp.lt.s32.totalorder %s2657_s10, %s2657_s10 }
 0x143   :  { %p2664_p0 = por %p2663_p13, %p2662_p12 }
 0x145   :  { %p2665_p1 = pnand %p2664_p0, %p2658_p11 }
 0x147   :  { %2668 = shalt.err (!%p2665_p1)
}
 0x148   :  { %s3254_s24 = sld [smem:[#allocation49_spill]]  ;;  %s2827_s11 = smov [#allocation25]  }
 0x149   :  { %218 = dma.hbm_to_vmem [thread:$0]  %s3253_s19, 256, %s3073_s1, [#allocation21], %s2819_s13, %s2819_s13, %s2820_s12  }
 0x14a   :  { %s236_s15 = sshll.u32 %s2827_s11, 4  ;;  %s2828_s16 = smov [#allocation28]   ;;  %s237_s15 = int_to_ptr.vmem [resolvable:$true] %s236_s15 }
 0x14b   :  { %s258_s9 = sshll.u32 %s2828_s16, 4  ;;  %s3091_s9 = int_to_ptr.vmem [resolvable:$true] %s258_s9 }
 0x14e   :  { %s2669_s21 = scalar_lea.hbm %s3254_s24, 256 }
 0x14f   :  { %p2670_p2 = scmp.ne.s32.totalorder %s3254_s24, %s2669_s21  ;;  %p2673_p3 = scmp.lt.u32.totalorder %s2669_s21, %s3254_s24 }
 0x151   :  { %p2675_p4 = pnand %p2673_p3, %p2670_p2 }
 0x153   :  { %2678 = shalt.err (!%p2675_p4)
}
 0x154   :  { %s2679_s18 = scalar_lea.vmem %s237_s15, 256  ;;  %p2684_p6 = scmp.lt.s32.totalorder %s237_s15, %s237_s15 }
 0x155   :  { %p2680_p5 = scmp.ne.s32.totalorder %s237_s15, %s2679_s18  ;;  %p2685_p7 = scmp.lt.s32.totalorder %s2679_s18, %s2679_s18 }
 0x157   :  { %p2686_p8 = por %p2685_p7, %p2684_p6 }
 0x159   :  { %p2687_p9 = pnand %p2686_p8, %p2680_p5 }
 0x15b   :  { %2690 = shalt.err (!%p2687_p9)
}
 0x15c   :  { %s3255_s6 = sld [smem:[#allocation50_spill]] }
 0x15d   :  { %242 = dma.hbm_to_vmem [thread:$0]  %s3254_s24, 256, %s237_s15, [#allocation24], %s2819_s13, %s2819_s13, %s2820_s12  }
 0x162   :  { %s2691_s17 = scalar_lea.hbm %s3255_s6, 256 }
 0x163   :  { %p2692_p10 = scmp.ne.s32.totalorder %s3255_s6, %s2691_s17  ;;  %p2695_p11 = scmp.lt.u32.totalorder %s2691_s17, %s3255_s6 }
 0x165   :  { %p2697_p12 = pnand %p2695_p11, %p2692_p10 }
 0x167   :  { %2700 = shalt.err (!%p2697_p12)
}
 0x168   :  { %s2701_s22 = scalar_lea.vmem %s3091_s9, 256  ;;  %p2706_p0 = scmp.lt.s32.totalorder %s3091_s9, %s3091_s9 }
 0x169   :  { %p2702_p13 = scmp.ne.s32.totalorder %s3091_s9, %s2701_s22  ;;  %p2707_p1 = scmp.lt.s32.totalorder %s2701_s22, %s2701_s22 }
 0x16b   :  { %p2708_p2 = por %p2707_p1, %p2706_p0 }
 0x16d   :  { %p2709_p3 = pnand %p2708_p2, %p2702_p13 }
 0x16f   :  { %2712 = shalt.err (!%p2709_p3)
}
 0x170   :  { %s3256_s0 = sld [smem:[#allocation54_spill]]  ;;  %s2829_s3 = smov [#allocation31]  }
 0x171   :  { %264 = dma.hbm_to_vmem [thread:$0]  %s3255_s6, 256, %s3091_s9, [#allocation27], %s2819_s13, %s2819_s13, %s2820_s12  }
 0x172   :  { %s287_s29 = sshll.u32 %s2829_s3, 4  ;;  %s288_s29 = int_to_ptr.vmem [resolvable:$true] %s287_s29 }
 0x176   :  { %s2713_s20 = scalar_lea.hbm %s3256_s0, 16 }
 0x177   :  { %p2714_p4 = scmp.ne.s32.totalorder %s3256_s0, %s2713_s20  ;;  %p2717_p5 = scmp.lt.u32.totalorder %s2713_s20, %s3256_s0 }
 0x179   :  { %p2719_p6 = pnand %p2717_p5, %p2714_p4 }
 0x17b   :  { %2722 = shalt.err (!%p2719_p6)
}
 0x17c   :  { %s2723_s8 = scalar_lea.vmem %s288_s29, 16  ;;  %s2727_s23 = scalar_lea.vmem %s288_s29, 32 }
 0x17d   :  { %p2724_p7 = scmp.ne.s32.totalorder %s288_s29, %s2723_s8  ;;  %p2728_p8 = scmp.lt.s32.totalorder %s288_s29, %s288_s29 }
 0x17e   :  { %p2729_p9 = scmp.lt.s32.totalorder %s2727_s23, %s2723_s8 }
 0x180   :  { %p2730_p10 = por %p2729_p9, %p2728_p8 }
 0x182   :  { %p2731_p11 = pnand %p2730_p10, %p2724_p7 }
 0x184   :  { %2734 = shalt.err (!%p2731_p11)
}
 0x185   :  { %290 = dma.hbm_to_vmem [thread:$0]  %s3256_s0, 16, %s288_s29, [#allocation30]  }
 0x186   :  { %2757 = dma.done.wait [#allocation3], 256  }
 0x187   :  { %2758 = vsyncadd [#allocation3], 4294967040 }
 0x188   :  { %2759 = dma.done.wait [#allocation6], 160  }
 0x189   :  { %2760 = vsyncadd [#allocation6], 4294967136 }
 0x18a   :  { %2761 = dma.done.wait [#allocation9], 144  }
 0x18b   :  { %2762 = vsyncadd [#allocation9], 4294967152 }
 0x18c   :  { %2763 = dma.done.wait [#allocation12], 272  }
 0x18d   :  { %2764 = vsyncadd [#allocation12], 4294967024 }
 0x18e   :  { %2765 = dma.done.wait [#allocation15], 272  }
 0x18f   :  { %2766 = vsyncadd [#allocation15], 4294967024 }
 0x190   :  { %2767 = dma.done.wait [#allocation18], 32  }
 0x191   :  { %2768 = vsyncadd [#allocation18], 4294967264 }
 0x192   :  { %2769 = dma.done.wait [#allocation21], 272  }
 0x193   :  { %2770 = vsyncadd [#allocation21], 4294967024 }
 0x194   :  { %2771 = dma.done.wait [#allocation24], 272  }
 0x195   :  { %2772 = vsyncadd [#allocation24], 4294967024 }
 0x196   :  { %2773 = dma.done.wait [#allocation27], 272  }
 0x197   :  { %2774 = vsyncadd [#allocation27], 4294967024 }
 0x198   :  { %2775 = dma.done.wait [#allocation30], 32  }
 0x199   :  { %2776 = vsyncadd [#allocation30], 4294967264  ;;  %s3257_s13 = sld [smem:[#allocation44_spill]]  ;;  %v2830_v0 = vmov 0.0|0.0   ;;  %s3258_s12 = sld [smem:[#allocation45_spill]]  ;;  %vm2831_vm0 = vmmov 0  }
 0x19a   :  { %2182 = vmatprep.subr.bf16.mxu0 %v2830_v0  ;;  %v2832_v1 = vmov 0.0   ;;  %v3124_v5 = vld [vmem:[#allocation5] sm:$0x3]  ;;  %vm363_vm1 = vcmask 130048   ;;  %v437_v6 = vld [vmem:[#allocation7] sm:$0xff]  ;;  %vm445_vm2 = vcmask 64512  }
 0x19b   :  { %2044 = vmatprep.mubr.msk.f32.mxu0 %vm2831_vm0, %v2832_v1  ;;  %2047 = vmatprep.subr.mxu1 %v2832_v1  ;;  %v599_v15 = vld [vmem:[#allocation10] sm:$0xff]  ;;  %v1935_v16 = vld [vmem:[#allocation8] ss:$0 sm:$0xff]  ;;  %vm524_vm3 = vcmask 261120   ;;  %v769_v22 = vld [vmem:[#allocation13] sm:$0xff]  ;;  %s3259_s26 = sld [smem:[#allocation52_spill]] }
 0x19c   :  { %2049 = vmatprep.mubr.msk.f32.mxu1 %vm2831_vm0, %v2832_v1  ;;  %2048 = vmatpush3.msra.mxu1 %v437_v6  ;;  %v3143_v21 = vld [vmem:[#allocation2] sm:$0xff]  ;;  %v770_v23 = vld [vmem:[#allocation13 + $0x8] sm:$0xff]  ;;  %v863_v34 = vld [vmem:[#allocation16] sm:$0xff]  ;;  %s3260_s28 = sld [smem:[#allocation48_spill]]  ;;  %s3261_s1 = sld [smem:[#allocation53_spill]]  ;;  %vm1866_vm4 = vcmask 25600  }
 0x19d   :  { %2185 = vmatprep.subr.bf16.mxu1 %v2830_v0  ;;  %v2195_v24 = vpack.c.bf16 %v770_v23, %v769_v22  ;;  %v1938_v25 = vld [vmem:[#allocation11] ss:$0 sm:$0xff]  ;;  %v361_v31 = vld [vmem:[#allocation2 + $0x8] sm:$0xff]  ;;  %v1943_v37 = vld [vmem:[#allocation14] ss:$0 sm:$0xff]  ;;  %s3262_s2 = sld [smem:[#allocation51_spill]] }
 0x19e   :  { %v864_v35 = vld [vmem:[#allocation16 + $0x8] sm:$0xff]  ;;  %v1023_v46 = vld [vmem:[#allocation22] sm:$0xff]  ;;  %v1024_v47 = vld [vmem:[#allocation22 + $0x8] sm:$0xff]  ;;  %s3263_s25 = sld [smem:[#allocation55_spill]]  ;;  %s3264_s14 = sld [smem:[#allocation56_spill]] }
 0x19f   :  { %v358_v2 = vld [vmem:[%s3257_s13] sm:$0xff]  ;;  %v359_v3 = vld [vmem:[%s3257_s13 + $0x8] sm:$0xff]  ;;  %v522_v12 = vld [vmem:[%s3258_s12 + $0x10] sm:$0xff]  ;;  %v2199_v36 = vpack.c.bf16 %v864_v35, %v863_v34  ;;  %v2207_v48 = vpack.c.bf16 %v1024_v47, %v1023_v46 }
 0x1a0   :  { %v2183_v4 = vpack.c.bf16 %v359_v3, %v358_v2  ;;  %v520_v7 = vld [vmem:[%s3258_s12] sm:$0xff]  ;;  %v521_v8 = vld [vmem:[%s3258_s12 + $0x8] sm:$0xff]  ;;  %v523_v13 = vld [vmem:[%s3258_s12 + $0x18] sm:$0xff] }
 0x1a1   :  { %v2186_v9 = vpack.c.bf16 %v521_v8, %v520_v7  ;;  %v2189_v14 = vpack.c.bf16 %v523_v13, %v522_v12  ;;  %v1946_v49 = vld [vmem:[#allocation17] ss:$0 sm:$0xff]  ;;  %v1953_v51 = vld [vmem:[%s3259_s26] ss:$0 sm:$0xff]  ;;  %v1954_v54 = vld [vmem:[#allocation29] ss:$0 sm:$0xff] }
 0x1a2   :  { %2184 = vmatpush3.bf16.msra.mxu0 %v2183_v4  ;;  %v1106_v62 = vld [vmem:[%s3260_s28] sm:$0xff]  ;;  %v1107_v63 = vld [vmem:[%s3260_s28 + $0x8] sm:$0xff]  ;;  %v1108_v6 = vld [vmem:[%s3260_s28 + $0x10] sm:$0xff] }
 0x1a3   :  { %v1109_v7 = vld [vmem:[%s3260_s28 + $0x18] sm:$0xff]  ;;  %v1957_v23 = vld [vmem:[#allocation26] ss:$0 sm:$0xff]  ;;  %v1960_v35 = vld [vmem:[%s3262_s2] ss:$0 sm:$0xff] }
 0x1a4   :  { %v2213_v8 = vpack.c.bf16 %v1109_v7, %v1108_v6  ;;  %v1950_v12 = vld [vmem:[#allocation23] ss:$0 sm:$0xff]  ;;  %v1617_v46 = vld [vmem:[%s3263_s25 + $0x10] sm:$0xff] }
 0x1a5   :  { %2045 = vmatmul.mubr.msk.f32.vlgmr.msra.gmra.mrb[0].mxu0 %vm363_vm1, %v3124_v5  ;;  %v1784_v7 = vld [vmem:[%s2982_s27 + $0x10] sm:$0xff] }
 0x1a6   :  { %2072 = vmatprep.mubr.msk.f32.mxu0 %vm363_vm1, %v3143_v21 }
 0x278   :  { %v433_v10 = vpop.f32.mrb[0].mxu0 }
 0x279   :  { %v2046_v11 = vpop.f32.mrb[1].mxu0  ;;  %2050 = vmatmul.mubr.msk.f32.vlgmr.msra.gmra.mrb[0].mxu1 %vm445_vm2, %v433_v10  ;;  %v1279_v10 = vld [vmem:[#allocation25 + $0x8] sm:$0xff] }
 0x27a   :  { %2187 = vmatpush3.bf16.msra.mxu1 %v2186_v9  ;;  %2060 = vmatprep.mubr.msk.f32.mxu1 %vm2831_vm0, %v2832_v1  ;;  %v1278_v9 = vld [vmem:[#allocation25] sm:$0xff] }
 0x27b   :  { %2188 = vmatprep.subr.bf16.mxu1 %v2830_v0  ;;  %v2219_v11 = vpack.c.bf16 %v1279_v10, %v1278_v9  ;;  %v1967_v10 = vld [vmem:[%s2977_s5] ss:$0 sm:$0xff]  ;;  %s2833_s5 = smov [#allocation32]  }
 0x27e   :  { %2190 = vmatpush3.bf16.msra.mxu1 %v2189_v14 }
 0x27f   :  { %2063 = vmatprep.subr.mxu1 %v599_v15 }
 0x34c   :  { %v515_v17 = vpop.f32.mrb[0].mxu1 }
 0x34d   :  { %v3137_v18 = vadd.f32 %v1935_v16, %v515_v17  ;;  %v2051_v19 = vpop.f32.mrb[1].mxu1 }
 0x34f   :  { %v519_v20 = vmax.f32 %v3137_v18, 0.0 }
 0x351   :  { %2061 = vmatmul.mubr.msk.f32.vlgmr.msra.gmra.mrb[2].mxu1 %vm524_vm3, %v519_v20  ;;  %v1372_v20 = vld [vmem:[#allocation28] sm:$0xff] }
 0x352   :  { %2064 = vmatpush3.msra.mxu1 %v599_v15  ;;  %2065 = vmatprep.mubr.msk.f32.mxu1 %vm445_vm2, %v358_v2  ;;  %v2210_v2 = vpack.c.bf16 %v1107_v63, %v1106_v62 }
 0x353   :  { %2196 = vmatprep.subr.bf16.mxu1 %v2195_v24 }
 0x355   :  { %2066 = vmatmul.mubr.msk.f32.vlgmr.msra.gmra.mrb[4].mxu1 %vm445_vm2, %v359_v3 }
 0x356   :  { %2198 = vmatpush3.bf16.msra.mxu1 %v2195_v24 }
 0x357   :  { %2203 = vmatprep.subr.bf16.mxu1 %v2830_v0 }
 0x428   :  { %v2067_v26 = vpop.f32.mrb[4].mxu1 }
 0x429   :  { %v685_v27 = vadd.f32 %v2067_v26, %v1938_v25  ;;  %v679_v28 = vpop.f32.mrb[5].mxu1 }
 0x42a   :  { %v680_v29 = vadd.f32 %v1938_v25, %v679_v28 }
 0x42c   :  { %v2191_v30 = vpack.c.bf16 %v685_v27, %v680_v29 }
 0x42e   :  { %2192 = vmatprep.subr.bf16.mxu0 %v2191_v30 }
 0x42f   :  { %2194 = vmatpush3.bf16.msra.mxu0 %v2191_v30 }
 0x430   :  { %2200 = vmatprep.subr.bf16.mxu0 %v2199_v36 }
 0x432   :  { %2073 = vmatmul.mubr.msk.f32.vlgmr.msra.gmra.mrb[2].mxu0 %vm363_vm1, %v361_v31 }
 0x433   :  { %2202 = vmatpush3.bf16.msra.mxu0 %v2199_v36 }
 0x434   :  { %2206 = vmatprep.subr.bf16.mxu0 %v2830_v0 }
 0x505   :  { %v2074_v32 = vpop.f32.mrb[2].mxu0 }
 0x506   :  { %v760_v33 = vpop.f32.mrb[3].mxu0 }
 0x507   :  { %2079 = vmatprep.mubr.msk.f32.mxu1 %vm363_vm1, %v760_v33 }
 0x508   :  { %2080 = vmatmul.mubr.msk.f32.vlgmr.msra.gmra.mrb[6].mxu1 %vm363_vm1, %v2074_v32 }
 0x509   :  { %2093 = vmatprep.mubr.msk.f32.mxu1 %vm2831_vm0, %v2832_v1 }
 0x5db   :  { %v2081_v38 = vpop.f32.mrb[6].mxu1 }
 0x5dc   :  { %v856_v39 = vadd.f32 %v2081_v38, %v1943_v37  ;;  %v850_v40 = vpop.f32.mrb[7].mxu1 }
 0x5dd   :  { %v851_v41 = vadd.f32 %v1943_v37, %v850_v40 }
 0x5de   :  { %v860_v42 = vmax.f32 %v856_v39, 0.0 }
 0x5df   :  { %v859_v43 = vmax.f32 %v851_v41, 0.0  ;;  %v1615_v41 = vld [vmem:[%s3263_s25] sm:$0xff] }
 0x5e0   :  { %v862_v44 = vadd.f32 %v2074_v32, %v860_v42  ;;  %v1532_v32 = vld [vmem:[%s3261_s1] sm:$0xff]  ;;  %v1616_v42 = vld [vmem:[%s3263_s25 + $0x8] sm:$0xff] }
 0x5e1   :  { %v861_v45 = vadd.f32 %v859_v43, %v760_v33  ;;  %v1533_v33 = vld [vmem:[%s3261_s1 + $0x8] sm:$0xff]  ;;  %v2234_v43 = vpack.c.bf16 %v1616_v42, %v1615_v41 }
 0x5e2   :  { %v2231_v34 = vpack.c.bf16 %v1533_v33, %v1532_v32 }
 0x5e3   :  { %2086 = vmatprep.mubr.msk.f32.mxu0 %vm363_vm1, %v861_v45 }
 0x5e4   :  { %2087 = vmatmul.mubr.msk.f32.vlgmr.msra.gmra.mrb[4].mxu0 %vm363_vm1, %v862_v44 }
 0x5e5   :  { %2100 = vmatprep.mubr.msk.f32.mxu0 %vm2831_vm0, %v2832_v1  ;;  %2208 = vmatpush3.bf16.msra.mxu0 %v2207_v48  ;;  %v1964_v48 = vld [vmem:[#allocation31] ss:$0 sm:$0xff] }
 0x6b7   :  { %v2088_v50 = vpop.f32.mrb[4].mxu0 }
 0x6b8   :  { %v950_v52 = vadd.f32 %v2088_v50, %v1946_v49  ;;  %v944_v53 = vpop.f32.mrb[5].mxu0 }
 0x6b9   :  { %v945_v55 = vadd.f32 %v1946_v49, %v944_v53 }
 0x6ba   :  { %v1193_v56 = vmul.f32 %v1953_v51, %v950_v52 }
 0x6bb   :  { %v2204_v57 = vpack.c.bf16 %v950_v52, %v945_v55  ;;  %v1192_v58 = vmul.f32 %v1953_v51, %v945_v55  ;;  %v1696_v55 = vld [vmem:[%s3264_s14] sm:$0xff] }
 0x6bc   :  { %v1202_v59 = vadd.f32 %v1954_v54, %v1193_v56  ;;  %v1697_v56 = vld [vmem:[%s3264_s14 + $0x8] sm:$0xff] }
 0x6bd   :  { %v1201_v60 = vadd.f32 %v1954_v54, %v1192_v58  ;;  %2205 = vmatpush3.bf16.msra.mxu1 %v2204_v57  ;;  %v2240_v57 = vpack.c.bf16 %v1697_v56, %v1696_v55  ;;  %v1698_v58 = vld [vmem:[%s3264_s14 + $0x10] sm:$0xff] }
 0x6be   :  { %2209 = vmatprep.subr.bf16.mxu1 %v2830_v0 }
 0x6bf   :  { %v2215_v61 = vpack.c.bf16 %v1202_v59, %v1201_v60  ;;  %v1699_v59 = vld [vmem:[%s3264_s14 + $0x18] sm:$0xff] }
 0x6c0   :  { %2094 = vmatmul.mubr.msk.f32.vlgmr.msra.gmra.mrb[8].mxu1 %vm363_vm1, %v3124_v5  ;;  %v2243_v60 = vpack.c.bf16 %v1699_v59, %v1698_v58 }
 0x6c1   :  { %2216 = vmatprep.subr.bf16.mxu0 %v2215_v61  ;;  %2111 = vmatprep.mubr.msk.f32.mxu1 %vm2831_vm0, %v2832_v1 }
 0x6c2   :  { %2211 = vmatpush3.bf16.msra.mxu1 %v2210_v2 }
 0x6c3   :  { %2212 = vmatprep.subr.bf16.mxu1 %v2830_v0 }
 0x6c6   :  { %2214 = vmatpush3.bf16.msra.mxu1 %v2213_v8  ;;  %v1785_v8 = vld [vmem:[%s2982_s27 + $0x18] sm:$0xff] }
 0x6c7   :  { %v2249_v9 = vpack.c.bf16 %v1785_v8, %v1784_v7 }
 0x793   :  { %v1019_v3 = vpop.f32.mrb[8].mxu1 }
 0x794   :  { %v2095_v4 = vpop.f32.mrb[9].mxu1  ;;  %2101 = vmatmul.mubr.msk.f32.vlgmr.msra.gmra.mrb[6].mxu0 %vm363_vm1, %v1019_v3  ;;  %v1782_v3 = vld [vmem:[%s2982_s27] sm:$0xff] }
 0x795   :  { %2218 = vmatpush3.bf16.msra.mxu0 %v2215_v61  ;;  %2118 = vmatprep.mubr.msk.f32.mxu0 %vm363_vm1, %v3143_v21  ;;  %v1373_v21 = vld [vmem:[#allocation28 + $0x8] sm:$0xff]  ;;  %v1783_v4 = vld [vmem:[%s2982_s27 + $0x8] sm:$0xff]  ;;  %s1886_s27 = sshll.u32 %s2833_s5, 4  ;;  %s1887_s27 = int_to_ptr.vmem [resolvable:$true] %s1886_s27 }
 0x796   :  { %2220 = vmatprep.subr.bf16.mxu0 %v2219_v11  ;;  %v2223_v22 = vpack.c.bf16 %v1373_v21, %v1372_v20  ;;  %v2246_v6 = vpack.c.bf16 %v1783_v4, %v1782_v3  ;;  %p2740_p13 = scmp.lt.s32.totalorder %s1887_s27, %s1887_s27 }
 0x798   :  { %2119 = vmatmul.mubr.msk.f32.vlgmr.msra.gmra.mrb[8].mxu0 %vm363_vm1, %v361_v31  ;;  %2224 = vmatprep.subr.bf16.mxu1 %v2223_v22 }
 0x799   :  { %2222 = vmatpush3.bf16.msra.mxu0 %v2219_v11 }
 0x79a   :  { %2227 = vmatprep.subr.bf16.mxu0 %v2830_v0 }
 0x867   :  { %v1101_v13 = vpop.f32.mrb[6].mxu0 }
 0x868   :  { %v1102_v14 = vadd.f32 %v1950_v12, %v1101_v13  ;;  %v2102_v15 = vpop.f32.mrb[7].mxu0 }
 0x86a   :  { %v1105_v16 = vmax.f32 %v1102_v14, 0.0  ;;  %v2251_v50 = vadd.f32 %v1102_v14, %v3137_v18 }
 0x86b   :  { %v2120_v17 = vpop.f32.mrb[8].mxu0 }
 0x86c   :  { %2112 = vmatmul.mubr.msk.f32.vlgmr.msra.gmra.mrb[2].mxu1 %vm524_vm3, %v1105_v16  ;;  %v1269_v19 = vpop.f32.mrb[9].mxu0 }
 0x86d   :  { %2125 = vmatprep.mubr.msk.f32.mxu0 %vm363_vm1, %v1269_v19  ;;  %2226 = vmatpush3.bf16.msra.mxu1 %v2223_v22 }
 0x86e   :  { %2126 = vmatmul.mubr.msk.f32.vlgmr.msra.gmra.mrb[10].mxu0 %vm363_vm1, %v2120_v17  ;;  %2230 = vmatprep.subr.bf16.mxu1 %v2830_v0 }
 0x86f   :  { %2139 = vmatprep.mubr.msk.f32.mxu0 %vm2831_vm0, %v2832_v1 }
 0x941   :  { %v2127_v24 = vpop.f32.mrb[10].mxu0 }
 0x942   :  { %v1365_v25 = vadd.f32 %v2127_v24, %v1957_v23  ;;  %v1359_v26 = vpop.f32.mrb[11].mxu0 }
 0x943   :  { %v1360_v27 = vadd.f32 %v1957_v23, %v1359_v26 }
 0x944   :  { %v1369_v28 = vmax.f32 %v1365_v25, 0.0 }
 0x945   :  { %v1368_v29 = vmax.f32 %v1360_v27, 0.0 }
 0x946   :  { %v1371_v30 = vadd.f32 %v2120_v17, %v1369_v28 }
 0x947   :  { %v1370_v31 = vadd.f32 %v1368_v29, %v1269_v19 }
 0x949   :  { %2132 = vmatprep.mubr.msk.f32.mxu1 %vm363_vm1, %v1370_v31 }
 0x94a   :  { %2133 = vmatmul.mubr.msk.f32.vlgmr.msra.gmra.mrb[10].mxu1 %vm363_vm1, %v1371_v30 }
 0x94b   :  { %2146 = vmatprep.mubr.msk.f32.mxu1 %vm2831_vm0, %v2832_v1  ;;  %2232 = vmatpush3.bf16.msra.mxu1 %v2231_v34 }
 0x94c   :  { %2233 = vmatprep.subr.bf16.mxu1 %v2830_v0 }
 0xa1d   :  { %v2134_v36 = vpop.f32.mrb[10].mxu1 }
 0xa1e   :  { %v1459_v37 = vadd.f32 %v2134_v36, %v1960_v35  ;;  %v1453_v38 = vpop.f32.mrb[11].mxu1 }
 0xa1f   :  { %v1454_v39 = vadd.f32 %v1960_v35, %v1453_v38 }
 0xa21   :  { %v2228_v40 = vpack.c.bf16 %v1459_v37, %v1454_v39 }
 0xa23   :  { %2229 = vmatpush3.bf16.msra.mxu0 %v2228_v40 }
 0xa24   :  { %2239 = vmatprep.subr.bf16.mxu0 %v2830_v0 }
 0xa26   :  { %2140 = vmatmul.mubr.msk.f32.vlgmr.msra.gmra.mrb[12].mxu0 %vm363_vm1, %v3124_v5  ;;  %v1618_v5 = vld [vmem:[%s3263_s25 + $0x18] sm:$0xff] }
 0xa27   :  { %2168 = vmatprep.mubr.msk.f32.mxu0 %vm2831_vm0, %v2832_v1  ;;  %v2237_v47 = vpack.c.bf16 %v1618_v5, %v1617_v46  ;;  %2241 = vmatpush3.bf16.msra.mxu0 %v2240_v57 }
 0xa28   :  { %2242 = vmatprep.subr.bf16.mxu0 %v2830_v0 }
 0xa2b   :  { %2244 = vmatpush3.bf16.msra.mxu0 %v2243_v60 }
 0xa2c   :  { %2245 = vmatprep.subr.bf16.mxu0 %v2830_v0 }
 0xaf9   :  { %v1528_v44 = vpop.f32.mrb[12].mxu0 }
 0xafa   :  { %v2141_v45 = vpop.f32.mrb[13].mxu0  ;;  %2147 = vmatmul.mubr.msk.f32.vlgmr.msra.gmra.mrb[12].mxu1 %vm363_vm1, %v1528_v44 }
 0xafb   :  { %2235 = vmatpush3.bf16.msra.mxu1 %v2234_v43  ;;  %2157 = vmatprep.mubr.msk.f32.mxu1 %vm2831_vm0, %v2832_v1 }
 0xafc   :  { %2236 = vmatprep.subr.bf16.mxu1 %v2830_v0 }
 0xaff   :  { %2238 = vmatpush3.bf16.msra.mxu1 %v2237_v47 }
 0xbcd   :  { %v1610_v49 = vpop.f32.mrb[12].mxu1 }
 0xbce   :  { %v1611_v51 = vadd.f32 %v1964_v48, %v1610_v49  ;;  %v2148_v52 = vpop.f32.mrb[13].mxu1 }
 0xbd0   :  { %v1614_v53 = vmax.f32 %v1611_v51, 0.0  ;;  %v2252_v54 = vadd.f32 %v2251_v50, %v1611_v51 }
 0xbd2   :  { %2158 = vmatmul.mubr.msk.f32.vlgmr.msra.gmra.mrb[2].mxu1 %vm524_vm3, %v1614_v53 }
 0xca5   :  { %v1688_v18 = vpop.f32.mrb[2].mxu1 }
 0xca6   :  { %v2253_v61 = vadd.f32 %v2252_v54, %v1688_v18  ;;  %v2159_v62 = vpop.f32.mrb[3].mxu1 }
 0xca8   :  { %v1694_v63 = vmax.f32 %v2253_v61, 0.0 }
 0xcaa   :  { %v1695_v2 = vmul.f32 0.5, %v1694_v63 }
 0xcac   :  { %2169 = vmatmul.mubr.msk.f32.vlgmr.msra.gmra.mrb[14].mxu0 %vm524_vm3, %v1695_v2 }
 0xcad   :  { %2179 = vmatprep.mubr.msk.f32.mxu0 %vm2831_vm0, %v2832_v1  ;;  %2247 = vmatpush3.bf16.msra.mxu0 %v2246_v6  ;;  %v1969_v1 = vld [vmem:[%s2987_s4] ss:$0 sm:$0xff]  ;;  %s2735_s4 = scalar_lea.vmem %s1887_s27, 32 }
 0xcae   :  { %2248 = vmatprep.subr.bf16.mxu0 %v2830_v0  ;;  %p2736_p12 = scmp.ne.s32.totalorder %s1887_s27, %s2735_s4  ;;  %p2741_p0 = scmp.lt.s32.totalorder %s2735_s4, %s2735_s4 }
 0xcb0   :  { %p2742_p1 = por %p2741_p0, %p2740_p13 }
 0xcb1   :  { %2250 = vmatpush3.bf16.msra.mxu0 %v2249_v9 }
 0xcb2   :  { %p2743_p2 = pnand %p2742_p1, %p2736_p12 }
 0xd7f   :  { %v1776_v11 = vpop.f32.mrb[14].mxu0 }
 0xd80   :  { %v1777_v12 = vadd.f32 %v1967_v10, %v1776_v11  ;;  %v2170_v13 = vpop.f32.mrb[15].mxu0 }
 0xd82   :  { %v1780_v14 = vmax.f32 %v1777_v12, 0.0 }
 0xd84   :  { %v1781_v15 = vadd.f32 %v1780_v14, %v1695_v2 }
 0xd86   :  { %2180 = vmatmul.mubr.msk.f32.vlgmr.msra.gmra.mrb[16].mxu0 %vm524_vm3, %v1781_v15 }
 0xe59   :  { %v1862_v16 = vpop.f32.mrb[16].mxu0 }
 0xe5a   :  { %v1863_v17 = vadd.f32 %v1969_v1, %v1862_v16  ;;  %v2181_v19 = vpop.f32.mrb[17].mxu0 }
 0xe5c   :  { %v1867_v20 = vsel %vm1866_vm4, %v1863_v17, -inf }
 0xe5d   :  { %1868 = vmax.xlane.f32.xlu0 %v1867_v20 }
 0xeea   :  { %v1869_v0 = vpop.xlane.xlu0 %1868 }
 0xeeb   :  { %v1870_v21 = vsub.f32 %v1863_v17, %v1869_v0 }
 0xeed   :  { %v1871_v22 = vmul.f32 1.442695, %v1870_v21 }
 0xeef   :  { %2313 = vpow2.f32 %v1871_v22 }
 0xef9   :  { %v2314_v23 = vpop.eup %2313 }
 0xefa   :  { %v1873_v24 = vsel %vm1866_vm4, %v2314_v23, 0.0 }
 0xefb   :  { %1874 = vadd.xlane.f32.xlu0 %v1873_v24 }
 0xf88   :  { %v1875_v25 = vpop.xlane.xlu0 %1874 }
 0xf89   :  { %2315 = vlog2.f32 %v1875_v25 }
 0xf93   :  { %v2316_v26 = vpop.eup %2315 }
 0xf94   :  { %v1877_v27 = vmul.f32 0.6931472, %v2316_v26 }
 0xf96   :  { %v1878_v28 = vsub.f32 %v1870_v21, %v1877_v27 }
 0xf98   :  { %1879 = vst.msk [vmem:[#allocation32] sm:$0x3] %vm1866_vm4, %v1878_v28 }
 0xf99   :  { %2746 = shalt.err (!%p2743_p2)
}
 0xf9a   :  { %s2747_s19 = scalar_lea.hbm %s2992_s30, 32 }
 0xf9b   :  { %p2748_p3 = scmp.ne.s32.totalorder %s2992_s30, %s2747_s19  ;;  %p2751_p4 = scmp.lt.u32.totalorder %s2747_s19, %s2992_s30 }
 0xf9d   :  { %p2753_p5 = pnand %p2751_p4, %p2748_p3 }
 0xf9f   :  { %2756 = shalt.err (!%p2753_p5)
}
 0xfa0   :  { %1889 = dma.vmem_to_hbm [thread:$0]  %s1887_s27, 32, %s2992_s30, [#allocation4]  }
 0xfa1   :  { %2777 = dma.done.wait [#allocation4], 32  }
 0xfa2   :  { %2778 = vsyncadd [#allocation4], 4294967264 }
 0xfa3   :  { %1893 = vsyncpa [#allocation3], 1 }
 0xfa4   :  { %1894 = vsyncpa [#allocation6], 1 }
 0xfa5   :  { %1895 = vsyncpa [#allocation9], 1 }
 0xfa6   :  { %1896 = vsyncpa [#allocation12], 1 }
 0xfa7   :  { %1897 = vsyncpa [#allocation15], 1 }
 0xfa8   :  { %1898 = vsyncpa [#allocation18], 1 }
 0xfa9   :  { %1899 = vsyncpa [#allocation21], 1 }
 0xfaa   :  { %1900 = vsyncpa [#allocation24], 1 }
 0xfab   :  { %1901 = vsyncpa [#allocation27], 1 }
 0xfac   :  { %1902 = vsyncpa [#allocation30], 1 }
 0xfad   :  { %1903 = vsyncpa [#allocation4], 1 }

</bundles_post_ra>
